<compile_context>
chip_gen: v6e
topology: v6e:2x2x1
jax: 0.10.0
libtpu: 0.0.40
codegen_flags: <defaults>
</compile_context>

<pallas_src>
import math

import jax
import jax.numpy as jnp
from jax.experimental import pallas as pl
from jax.experimental.pallas import tpu as pltpu

# ---------------- model hyperparameters (small, consistent with the module) --
BATCH = 2
SEQLEN = 8
HIDDEN = 32
NUM_HEADS = 2
HEAD_DIM = HIDDEN // NUM_HEADS          # 16 (even, needed for RoPE halves)
ROTARY_BASE = 10000.0
NEG_INF = -1e30


# ----------------------------- Pallas kernel --------------------------------
def _flexbert_rope_attn_kernel(
    h_ref,      # (1, S, D)     f32   hidden states for one sequence
    wqkv_ref,   # (D, 3D)       bf16  fused QKV projection (untiled, block 0)
    bqkv_ref,   # (1, 3D)       f32
    cos_ref,    # (1, S, HD)    f32   cos table tiled over both halves
    sin_ref,    # (1, S, HD)    f32   [-sin, +sin] rotate-half sin table
    bias_ref,   # (1, 1, S)     f32   key-padding additive bias (0 / -1e30)
    wo_ref,     # (D, D)        bf16  output projection (untiled, block 0)
    bo_ref,     # (1, D)        f32
    o_ref,      # (1, S, D)     f32
):
    S, D = h_ref.shape[1], h_ref.shape[2]
    HD = cos_ref.shape[2]
    H = D // HD
    half = HD // 2
    scale = 1.0 / math.sqrt(HD)
    f32, bf16 = jnp.float32, jnp.bfloat16

    # --- fused QKV projection: one wide, lane-dense MXU matmul --------------
    h = h_ref[0].astype(bf16)                                         # (S, D)
    qkv = jnp.dot(h, wqkv_ref[...],
                  preferred_element_type=f32) + bqkv_ref[...]         # (S, 3D)

    # --- split into heads AFTER the projection: (H, S, HD) ------------------
    # Static lane slices stacked along a new leading (untiled) axis; no H-fold
    # replication of the hidden states through the MXU.
    def split_heads(col0):
        return jnp.stack(
            [qkv[:, col0 + hh * HD: col0 + (hh + 1) * HD] for hh in range(H)],
            axis=0)

    q = split_heads(0)          # (H, S, HD)  torch view order: q | k | v blocks
    k = split_heads(D)
    v = split_heads(2 * D)

    # --- non-interleaved RoPE as a rotate-half (XLU roll + 2 VPU FMAs) ------
    # cos/sin stay (1, S, HD) and broadcast over the head axis in the multiply;
    # the 1/sqrt(HD) softmax scale is folded into q here (S*HD mults, not S*S).
    cos = cos_ref[...]
    sin = sin_ref[...]
    q = (q * cos + pltpu.roll(q, half, 2) * sin) * scale
    k = k * cos + pltpu.roll(k, half, 2) * sin

    # --- head-batched scores + key-padding bias + softmax (f32 stats) -------
    s = jnp.einsum("hqd,hkd->hqk", q.astype(bf16), k.astype(bf16),
                   preferred_element_type=f32)                        # (H, S, S)
    s = s + bias_ref[...]                                             # (1,1,S)

    m = jnp.max(s, axis=-1, keepdims=True)
    e = jnp.exp(s - m)
    p = e * pl.reciprocal(jnp.sum(e, axis=-1, keepdims=True), approx=True)

    ctx = jnp.einsum("hqk,hkd->hqd", p.astype(bf16), v.astype(bf16),
                     preferred_element_type=f32)                      # (H, S, HD)

    # --- fuse heads back onto lanes -> one (H*HD, D) output matmul ----------
    ctx_flat = jnp.concatenate([ctx[hh] for hh in range(H)], axis=-1)  # (S, D)
    out = jnp.dot(ctx_flat.astype(bf16), wo_ref[...],
                  preferred_element_type=f32) + bo_ref[...]           # (S, D)
    o_ref[0] = out.astype(o_ref.dtype)


# ------------------------------- wrapper -------------------------------------
def flexbert_padded_rope_attention(hidden_states, attn_mask, params):
    """hidden_states: (B, S, D) f32; attn_mask: (B, S) (1 = keep, 0 = pad)."""
    B, S, D = hidden_states.shape
    H, HD = NUM_HEADS, HEAD_DIM

    # Untiled parameters (a few KB here, ~5 MB at production BERT sizes) --
    # every grid step maps to block 0, so they stay resident across the grid.
    wqkv = params["wqkv"].astype(jnp.bfloat16)                    # (D, 3D)
    bqkv = params["bqkv"].reshape(1, 3 * D).astype(jnp.float32)   # (1, 3D)
    wo = params["wo"].astype(jnp.bfloat16)                        # (D, D)
    bo = params["bo"].reshape(1, D).astype(jnp.float32)           # (1, D)

    # --- RoPE tables (flash_attn RotaryEmbedding, non-interleaved, offset 0),
    #     with the rotate-half sign baked into the sin table ---
    inv_freq = 1.0 / (ROTARY_BASE ** (jnp.arange(0, HD, 2, dtype=jnp.float32) / HD))
    freqs = jnp.outer(jnp.arange(S, dtype=jnp.float32), inv_freq)     # (S, HD//2)
    cos_full = jnp.concatenate([jnp.cos(freqs), jnp.cos(freqs)], -1)[None]   # (1,S,HD)
    sin_signed = jnp.concatenate([-jnp.sin(freqs), jnp.sin(freqs)], -1)[None]

    # --- key-padding mask as a precomputed additive bias per sequence ---
    kp_bias = jnp.where(attn_mask > 0, 0.0, NEG_INF).astype(jnp.float32)[:, None, :]  # (B,1,S)

    grid_spec = pltpu.PrefetchScalarGridSpec(
        num_scalar_prefetch=0,
        grid=(B,),
        in_specs=[
            pl.BlockSpec((1, S, D), lambda i: (i, 0, 0)),      # hidden states
            pl.BlockSpec((D, 3 * D), lambda i: (0, 0)),        # Wqkv (untiled)
            pl.BlockSpec((1, 3 * D), lambda i: (0, 0)),        # bqkv
            pl.BlockSpec((1, S, HD), lambda i: (0, 0, 0)),     # cos table
            pl.BlockSpec((1, S, HD), lambda i: (0, 0, 0)),     # signed sin table
            pl.BlockSpec((1, 1, S), lambda i: (i, 0, 0)),      # key-padding bias
            pl.BlockSpec((D, D), lambda i: (0, 0)),            # Wo (untiled)
            pl.BlockSpec((1, D), lambda i: (0, 0)),            # bo
        ],
        out_specs=pl.BlockSpec((1, S, D), lambda i: (i, 0, 0)),
    )

    return pl.pallas_call(
        _flexbert_rope_attn_kernel,
        out_shape=jax.ShapeDtypeStruct((B, S, D), hidden_states.dtype),
        grid_spec=grid_spec,
        compiler_params=pltpu.CompilerParams(
            dimension_semantics=("parallel",),
            vmem_limit_bytes=32 * 1024 * 1024),
    )(hidden_states, wqkv, bqkv, cos_full, sin_signed, kp_bias, wo, bo)


# ----------------------------- plain-JAX reference ---------------------------
def reference(hidden_states, attn_mask, params):
    B, S, D = hidden_states.shape
    H, HD = NUM_HEADS, HEAD_DIM
    wqkv, bqkv, wo, bo = (params["wqkv"], params["bqkv"],
                          params["wo"], params["bo"])

    inv_freq = 1.0 / (ROTARY_BASE ** (jnp.arange(0, HD, 2, dtype=jnp.float32) / HD))
    freqs = jnp.outer(jnp.arange(S, dtype=jnp.float32), inv_freq)
    cos = jnp.cos(freqs)[None, :, None, :]
    sin = jnp.sin(freqs)[None, :, None, :]

    qkv = hidden_states @ wqkv + bqkv                         # (B, S, 3D)
    qkv = qkv.reshape(B, S, 3, H, HD)
    q, k, v = qkv[:, :, 0], qkv[:, :, 1], qkv[:, :, 2]        # (B, S, H, HD)

    def rope(x):
        x1, x2 = x[..., :HD // 2], x[..., HD // 2:]
        return jnp.concatenate([x1 * cos - x2 * sin, x2 * cos + x1 * sin], -1)

    q, k = rope(q), rope(k)
    scores = jnp.einsum("bqhd,bkhd->bhqk", q, k) / math.sqrt(HD)
    bias = jnp.where(attn_mask[:, None, None, :] > 0, 0.0, NEG_INF)
    probs = jax.nn.softmax(scores + bias, axis=-1)
    ctx = jnp.einsum("bhqk,bkhd->bqhd", probs, v).reshape(B, S, D)
    return ctx @ wo + bo


# ------------------------------------ main -----------------------------------
if __name__ == "__main__":
    key = jax.random.PRNGKey(0)
    k_h, k_wqkv, k_bqkv, k_wo, k_bo = jax.random.split(key, 5)

    hidden_states = jax.random.normal(k_h, (BATCH, SEQLEN, HIDDEN), jnp.float32)

    # Deterministic synthetic parameters (shapes from the module __init__).
    params = {
        "wqkv": jax.random.normal(k_wqkv, (HIDDEN, 3 * HIDDEN), jnp.float32)
                * (1.0 / math.sqrt(HIDDEN)),
        "bqkv": jax.random.normal(k_bqkv, (3 * HIDDEN,), jnp.float32) * 0.02,
        "wo":   jax.random.normal(k_wo, (HIDDEN, HIDDEN), jnp.float32)
                * (1.0 / math.sqrt(HIDDEN)),
        "bo":   jax.random.normal(k_bo, (HIDDEN,), jnp.float32) * 0.02,
    }

    # Padded-sequence key mask: 1 = real token, 0 = padding.
    attn_mask = jnp.array(
        [[1, 1, 1, 1, 1, 1, 0, 0],
         [1, 1, 1, 1, 1, 0, 0, 0]], dtype=jnp.float32)

    out = flexbert_padded_rope_attention(hidden_states, attn_mask, params)
    out = jax.block_until_ready(out)

    ref = reference(hidden_states, attn_mask, params)
    assert out.shape == (BATCH, SEQLEN, HIDDEN)
    assert jnp.all(jnp.isfinite(out))
    # bf16 MXU operands + approx reciprocal vs the f32 reference.
    assert jnp.allclose(out, ref, atol=4e-2, rtol=4e-2), "mismatch vs reference"

    print("KERNEL_OK")
</pallas_src>

<mosaic_0001>
module attributes {stable_mosaic.version = 11 : i64} {
  func.func @_flexbert_rope_attn_kernel(%arg0: i32, %arg1: memref<1x8x32xf32, #tpu.memory_space<vmem>>, %arg2: memref<32x96xbf16, #tpu.memory_space<vmem>>, %arg3: memref<1x96xf32, #tpu.memory_space<vmem>>, %arg4: memref<1x8x16xf32, #tpu.memory_space<vmem>>, %arg5: memref<1x8x16xf32, #tpu.memory_space<vmem>>, %arg6: memref<1x1x8xf32, #tpu.memory_space<vmem>>, %arg7: memref<32x32xbf16, #tpu.memory_space<vmem>>, %arg8: memref<1x32xf32, #tpu.memory_space<vmem>>, %arg9: memref<1x8x32xf32, #tpu.memory_space<vmem>>) attributes {dimension_semantics = [#tpu.dimension_semantics<parallel>], iteration_bounds = array<i64: 2>, scalar_prefetch = 0 : i64, scratch_operands = 0 : i64, tpu.core_type = #tpu.core_type<tc>, window_params = [{transform_indices = @transform_0, window_bounds = array<i64: 1, 8, 32>}, {pipeline_mode = #tpu.pipeline_mode<synchronous>, transform_indices = @transform_1, window_bounds = array<i64: 32, 96>}, {pipeline_mode = #tpu.pipeline_mode<synchronous>, transform_indices = @transform_2, window_bounds = array<i64: 1, 96>}, {pipeline_mode = #tpu.pipeline_mode<synchronous>, transform_indices = @transform_3, window_bounds = array<i64: 1, 8, 16>}, {pipeline_mode = #tpu.pipeline_mode<synchronous>, transform_indices = @transform_4, window_bounds = array<i64: 1, 8, 16>}, {transform_indices = @transform_5, window_bounds = array<i64: 1, 1, 8>}, {pipeline_mode = #tpu.pipeline_mode<synchronous>, transform_indices = @transform_6, window_bounds = array<i64: 32, 32>}, {pipeline_mode = #tpu.pipeline_mode<synchronous>, transform_indices = @transform_7, window_bounds = array<i64: 1, 32>}, {transform_indices = @transform_8, window_bounds = array<i64: 1, 8, 32>}]} {
    %c0 = arith.constant 0 : index
    %c0_0 = arith.constant 0 : index
    %c0_1 = arith.constant 0 : index
    %0 = vector.load %arg1[%c0, %c0_0, %c0_1] : memref<1x8x32xf32, #tpu.memory_space<vmem>>, vector<1x8x32xf32>
    %1 = vector.shape_cast %0 : vector<1x8x32xf32> to vector<8x32xf32>
    %2 = arith.truncf %1 : vector<8x32xf32> to vector<8x32xbf16>
    %c0_2 = arith.constant 0 : index
    %c0_3 = arith.constant 0 : index
    %3 = vector.load %arg2[%c0_2, %c0_3] : memref<32x96xbf16, #tpu.memory_space<vmem>>, vector<32x96xbf16>
    %cst = arith.constant dense<0.000000e+00> : vector<8x96xf32>
    %4 = tpu.matmul %2, %3, %cst {dimension_numbers = #tpu.dot_dimension_numbers<[1], [0], [0], [1], [0, 0, 1, 1], [], []>} : vector<8x32xbf16>, vector<32x96xbf16>, vector<8x96xf32> -> vector<8x96xf32>
    %c0_4 = arith.constant 0 : index
    %c0_5 = arith.constant 0 : index
    %5 = vector.load %arg3[%c0_4, %c0_5] : memref<1x96xf32, #tpu.memory_space<vmem>>, vector<1x96xf32>
    %6 = vector.broadcast %5 : vector<1x96xf32> to vector<8x96xf32>
    %7 = arith.addf %4, %6 : vector<8x96xf32>
    %8 = vector.extract_strided_slice %7 {offsets = [0, 0], sizes = [8, 16], strides = [1, 1]} : vector<8x96xf32> to vector<8x16xf32>
    %9 = vector.extract_strided_slice %7 {offsets = [0, 16], sizes = [8, 16], strides = [1, 1]} : vector<8x96xf32> to vector<8x16xf32>
    %10 = vector.shape_cast %8 : vector<8x16xf32> to vector<1x8x16xf32>
    %11 = vector.shape_cast %9 : vector<8x16xf32> to vector<1x8x16xf32>
    %12 = tpu.concatenate %10, %11 in 0 : vector<1x8x16xf32>, vector<1x8x16xf32> -> vector<2x8x16xf32>
    %13 = vector.extract_strided_slice %7 {offsets = [0, 32], sizes = [8, 16], strides = [1, 1]} : vector<8x96xf32> to vector<8x16xf32>
    %14 = vector.extract_strided_slice %7 {offsets = [0, 48], sizes = [8, 16], strides = [1, 1]} : vector<8x96xf32> to vector<8x16xf32>
    %15 = vector.shape_cast %13 : vector<8x16xf32> to vector<1x8x16xf32>
    %16 = vector.shape_cast %14 : vector<8x16xf32> to vector<1x8x16xf32>
    %17 = tpu.concatenate %15, %16 in 0 : vector<1x8x16xf32>, vector<1x8x16xf32> -> vector<2x8x16xf32>
    %18 = vector.extract_strided_slice %7 {offsets = [0, 64], sizes = [8, 16], strides = [1, 1]} : vector<8x96xf32> to vector<8x16xf32>
    %19 = vector.extract_strided_slice %7 {offsets = [0, 80], sizes = [8, 16], strides = [1, 1]} : vector<8x96xf32> to vector<8x16xf32>
    %20 = vector.shape_cast %18 : vector<8x16xf32> to vector<1x8x16xf32>
    %21 = vector.shape_cast %19 : vector<8x16xf32> to vector<1x8x16xf32>
    %22 = tpu.concatenate %20, %21 in 0 : vector<1x8x16xf32>, vector<1x8x16xf32> -> vector<2x8x16xf32>
    %c0_6 = arith.constant 0 : index
    %c0_7 = arith.constant 0 : index
    %c0_8 = arith.constant 0 : index
    %23 = vector.load %arg4[%c0_6, %c0_7, %c0_8] : memref<1x8x16xf32, #tpu.memory_space<vmem>>, vector<1x8x16xf32>
    %c0_9 = arith.constant 0 : index
    %c0_10 = arith.constant 0 : index
    %c0_11 = arith.constant 0 : index
    %24 = vector.load %arg5[%c0_9, %c0_10, %c0_11] : memref<1x8x16xf32, #tpu.memory_space<vmem>>, vector<1x8x16xf32>
    %25 = vector.broadcast %23 : vector<1x8x16xf32> to vector<2x8x16xf32>
    %26 = arith.mulf %12, %25 : vector<2x8x16xf32>
    %c8_i32 = arith.constant 8 : i32
    %27 = tpu.dynamic_rotate %12 by %c8_i32 dim 2 : vector<2x8x16xf32>, i32 -> vector<2x8x16xf32>
    %28 = vector.broadcast %24 : vector<1x8x16xf32> to vector<2x8x16xf32>
    %29 = arith.mulf %27, %28 : vector<2x8x16xf32>
    %30 = arith.addf %26, %29 : vector<2x8x16xf32>
    %cst_12 = arith.constant 2.500000e-01 : f32
    %31 = vector.broadcast %cst_12 : f32 to vector<2x8x16xf32>
    %32 = arith.mulf %30, %31 : vector<2x8x16xf32>
    %33 = vector.broadcast %23 : vector<1x8x16xf32> to vector<2x8x16xf32>
    %34 = arith.mulf %17, %33 : vector<2x8x16xf32>
    %c8_i32_13 = arith.constant 8 : i32
    %35 = tpu.dynamic_rotate %17 by %c8_i32_13 dim 2 : vector<2x8x16xf32>, i32 -> vector<2x8x16xf32>
    %36 = vector.broadcast %24 : vector<1x8x16xf32> to vector<2x8x16xf32>
    %37 = arith.mulf %35, %36 : vector<2x8x16xf32>
    %38 = arith.addf %34, %37 : vector<2x8x16xf32>
    %39 = arith.truncf %32 : vector<2x8x16xf32> to vector<2x8x16xbf16>
    %40 = arith.truncf %38 : vector<2x8x16xf32> to vector<2x8x16xbf16>
    "tpu.trace_start"() <{level = 10 : i32, message = "hqd,hkd->hqk"}> : () -> ()
    %cst_14 = arith.constant dense<0.000000e+00> : vector<2x8x8xf32>
    %41 = tpu.matmul %39, %40, %cst_14 {dimension_numbers = #tpu.dot_dimension_numbers<[2], [2], [1], [1], [0, 0, 0, 1, 1, 1], [0], [0]>} : vector<2x8x16xbf16>, vector<2x8x16xbf16>, vector<2x8x8xf32> -> vector<2x8x8xf32>
    "tpu.trace_stop"() : () -> ()
    %c0_15 = arith.constant 0 : index
    %c0_16 = arith.constant 0 : index
    %c0_17 = arith.constant 0 : index
    %42 = vector.load %arg6[%c0_15, %c0_16, %c0_17] : memref<1x1x8xf32, #tpu.memory_space<vmem>>, vector<1x1x8xf32>
    %43 = vector.broadcast %42 : vector<1x1x8xf32> to vector<2x8x8xf32>
    %44 = arith.addf %41, %43 : vector<2x8x8xf32>
    %cst_18 = arith.constant dense<0xFF800000> : vector<2x8xf32>
    %45 = vector.multi_reduction <maximumf>, %44, %cst_18 [2] : vector<2x8x8xf32> to vector<2x8xf32>
    %46 = vector.shape_cast %45 : vector<2x8xf32> to vector<2x8x1xf32>
    %47 = vector.broadcast %46 : vector<2x8x1xf32> to vector<2x8x8xf32>
    %48 = arith.subf %44, %47 : vector<2x8x8xf32>
    %49 = math.exp %48 : vector<2x8x8xf32>
    %cst_19 = arith.constant dense<0.000000e+00> : vector<2x8xf32>
    %50 = vector.multi_reduction <add>, %49, %cst_19 [2] : vector<2x8x8xf32> to vector<2x8xf32>
    %51 = vector.shape_cast %50 : vector<2x8xf32> to vector<2x8x1xf32>
    %52 = tpu.reciprocal %51 {approx = true} : vector<2x8x1xf32> -> vector<2x8x1xf32>
    %53 = vector.broadcast %52 : vector<2x8x1xf32> to vector<2x8x8xf32>
    %54 = arith.mulf %49, %53 : vector<2x8x8xf32>
    %55 = arith.truncf %54 : vector<2x8x8xf32> to vector<2x8x8xbf16>
    %56 = arith.truncf %22 : vector<2x8x16xf32> to vector<2x8x16xbf16>
    "tpu.trace_start"() <{level = 10 : i32, message = "hqk,hkd->hqd"}> : () -> ()
    %cst_20 = arith.constant dense<0.000000e+00> : vector<2x8x16xf32>
    %57 = tpu.matmul %55, %56, %cst_20 {dimension_numbers = #tpu.dot_dimension_numbers<[2], [1], [1], [2], [0, 0, 0, 1, 1, 2], [0], [0]>} : vector<2x8x8xbf16>, vector<2x8x16xbf16>, vector<2x8x16xf32> -> vector<2x8x16xf32>
    "tpu.trace_stop"() : () -> ()
    %58 = vector.extract_strided_slice %57 {offsets = [0, 0, 0], sizes = [1, 8, 16], strides = [1, 1, 1]} : vector<2x8x16xf32> to vector<1x8x16xf32>
    %59 = vector.shape_cast %58 : vector<1x8x16xf32> to vector<8x16xf32>
    %60 = vector.extract_strided_slice %57 {offsets = [1, 0, 0], sizes = [1, 8, 16], strides = [1, 1, 1]} : vector<2x8x16xf32> to vector<1x8x16xf32>
    %61 = vector.shape_cast %60 : vector<1x8x16xf32> to vector<8x16xf32>
    %62 = tpu.concatenate %59, %61 in 1 : vector<8x16xf32>, vector<8x16xf32> -> vector<8x32xf32>
    %63 = arith.truncf %62 : vector<8x32xf32> to vector<8x32xbf16>
    %c0_21 = arith.constant 0 : index
    %c0_22 = arith.constant 0 : index
    %64 = vector.load %arg7[%c0_21, %c0_22] : memref<32x32xbf16, #tpu.memory_space<vmem>>, vector<32x32xbf16>
    %cst_23 = arith.constant dense<0.000000e+00> : vector<8x32xf32>
    %65 = tpu.matmul %63, %64, %cst_23 {dimension_numbers = #tpu.dot_dimension_numbers<[1], [0], [0], [1], [0, 0, 1, 1], [], []>} : vector<8x32xbf16>, vector<32x32xbf16>, vector<8x32xf32> -> vector<8x32xf32>
    %c0_24 = arith.constant 0 : index
    %c0_25 = arith.constant 0 : index
    %66 = vector.load %arg8[%c0_24, %c0_25] : memref<1x32xf32, #tpu.memory_space<vmem>>, vector<1x32xf32>
    %67 = vector.broadcast %66 : vector<1x32xf32> to vector<8x32xf32>
    %68 = arith.addf %65, %67 : vector<8x32xf32>
    %c0_26 = arith.constant 0 : index
    %c0_27 = arith.constant 0 : index
    %c0_28 = arith.constant 0 : index
    %69 = vector.load %arg9[%c0_26, %c0_27, %c0_28] : memref<1x8x32xf32, #tpu.memory_space<vmem>>, vector<1x8x32xf32>
    %70 = vector.shape_cast %69 : vector<1x8x32xf32> to vector<8x32xf32>
    %71 = vector.shape_cast %68 : vector<8x32xf32> to vector<1x8x32xf32>
    tpu.vector_store %arg9[%c0_26, %c0_27, %c0_28], %71 {strides = array<i32>} : memref<1x8x32xf32, #tpu.memory_space<vmem>>, vector<1x8x32xf32>,
    return
  }
  func.func @transform_0(%arg0: i32) -> (i32, i32, i32) {
    %c0_i32 = arith.constant 0 : i32
    %c0_i32_0 = arith.constant 0 : i32
    %c0_i32_1 = arith.constant 0 : i32
    return %arg0, %c0_i32, %c0_i32_0 : i32, i32, i32
  }
  func.func @transform_1(%arg0: i32) -> (i32, i32) {
    %c0_i32 = arith.constant 0 : i32
    %c0_i32_0 = arith.constant 0 : i32
    %c0_i32_1 = arith.constant 0 : i32
    return %c0_i32, %c0_i32_0 : i32, i32
  }
  func.func @transform_2(%arg0: i32) -> (i32, i32) {
    %c0_i32 = arith.constant 0 : i32
    %c0_i32_0 = arith.constant 0 : i32
    %c0_i32_1 = arith.constant 0 : i32
    return %c0_i32, %c0_i32_0 : i32, i32
  }
  func.func @transform_3(%arg0: i32) -> (i32, i32, i32) {
    %c0_i32 = arith.constant 0 : i32
    %c0_i32_0 = arith.constant 0 : i32
    %c0_i32_1 = arith.constant 0 : i32
    %c0_i32_2 = arith.constant 0 : i32
    return %c0_i32, %c0_i32_0, %c0_i32_1 : i32, i32, i32
  }
  func.func @transform_4(%arg0: i32) -> (i32, i32, i32) {
    %c0_i32 = arith.constant 0 : i32
    %c0_i32_0 = arith.constant 0 : i32
    %c0_i32_1 = arith.constant 0 : i32
    %c0_i32_2 = arith.constant 0 : i32
    return %c0_i32, %c0_i32_0, %c0_i32_1 : i32, i32, i32
  }
  func.func @transform_5(%arg0: i32) -> (i32, i32, i32) {
    %c0_i32 = arith.constant 0 : i32
    %c0_i32_0 = arith.constant 0 : i32
    %c0_i32_1 = arith.constant 0 : i32
    return %arg0, %c0_i32, %c0_i32_0 : i32, i32, i32
  }
  func.func @transform_6(%arg0: i32) -> (i32, i32) {
    %c0_i32 = arith.constant 0 : i32
    %c0_i32_0 = arith.constant 0 : i32
    %c0_i32_1 = arith.constant 0 : i32
    return %c0_i32, %c0_i32_0 : i32, i32
  }
  func.func @transform_7(%arg0: i32) -> (i32, i32) {
    %c0_i32 = arith.constant 0 : i32
    %c0_i32_0 = arith.constant 0 : i32
    %c0_i32_1 = arith.constant 0 : i32
    return %c0_i32, %c0_i32_0 : i32, i32
  }
  func.func @transform_8(%arg0: i32) -> (i32, i32, i32) {
    %c0_i32 = arith.constant 0 : i32
    %c0_i32_0 = arith.constant 0 : i32
    %c0_i32_1 = arith.constant 0 : i32
    return %arg0, %c0_i32, %c0_i32_0 : i32, i32, i32
  }
}

</mosaic_0001>

<bundles_post_ra>
// kernel: tpu_custom_call.1
= control target key start
LH: loop header
LB: loop body
LE: loop exit
PB: predicated region body
PF: predicated region fallthrough
CT: control target
= control target key end

     0   :  { %s1748_s0 = inlined_call_operand.hbm [shape: f32[2,8,32], index: 0, kind: input, shape index: {}]   ;;  %s1749_s1 = inlined_call_operand.hbm [shape: bf16[32,96], index: 1, kind: input, shape index: {}]   ;;  %s1750_s2 = inlined_call_operand.vmem [shape: f32[1,96], index: 2, kind: input, shape index: {}]   ;;  %s1751_s3 = inlined_call_operand.hbm [shape: f32[1,8,16], index: 3, kind: input, shape index: {}]   ;;  %s1752_s4 = inlined_call_operand.hbm [shape: f32[1,8,16], index: 4, kind: input, shape index: {}]   ;;  %s1753_s5 = inlined_call_operand.vmem [shape: f32[2,1,8], index: 5, kind: input, shape index: {}]   ;;  %s1754_s6 = inlined_call_operand.hbm [shape: bf16[32,32], index: 6, kind: input, shape index: {}]   ;;  %s1755_s7 = inlined_call_operand.vmem [shape: f32[1,32], index: 7, kind: input, shape index: {}]   ;;  %s1756_s8 = inlined_call_operand.hbm [shape: f32[2,8,32], index: 8, kind: output, shape index: {}]  }
   0x1   :  { %1761 = sst [smem:[#allocation16_spill]] %s1749_s1 }
   0x2   :  { %1762 = sst [smem:[#allocation17_spill]] %s1751_s3 }
   0x3   :  { %1763 = sst [smem:[#allocation18_spill]] %s1752_s4 }
   0x4   :  { %13 = vsyncpa [#allocation3], 0 }
   0x5   :  { %15 = vsyncpa [#allocation3 + $0x1], 0 }
   0x6   :  { %16 = vsyncpa [#allocation6], 0 }
   0x7   :  { %17 = vsyncpa [#allocation9], 0 }
   0x8   :  { %18 = vsyncpa [#allocation4], 0 }
   0x9   :  { %20 = vsyncpa [#allocation4 + $0x1], 0  ;;  %s1441_s27 = smov 0   ;;  %s1443_s28 = smov 0  }
   0xa   :  { %s1445_s29 = smov 0   ;;  %s1447_s30 = smov 0  }
   0xb LB: > { %s1378_s9 = smov [#allocation5]   ;;  %s1462_s11 = sadd.s32 4294967295, %s1376_s30   ;;  %s1376_s30 = sphi %s1447_s30, %s1786_s30   ;;  %s1372_s29 = sphi %s1445_s29, %s1785_s29   ;;  %s1368_s28 = sphi %s1443_s28, %s1784_s28   ;;  %s1364_s27 = sphi %s1441_s27, %s1783_s27  }
   0xc   : > { %s247_s10 = sshll.u32 %s1378_s9, 4  ;;  %p975_p0 = scmp.ge.s32.totalorder %s1376_s30, 1  ;;  %s248_s10 = int_to_ptr.vmem [resolvable:$true] %s247_s10 }
   0xd   : > { %p1757_p1 = scmp.eq.s32.totalorder %s1462_s11, 0  ;;  %p235_p2 = scmp.lt.s32.totalorder %s1376_s30, 3 }
   0xe   : > { %s1379_s13 = smov [#allocation8]   ;;  %s1380_s16 = smov [#allocation7]  }
   0xf   : > { %p1467_p3 = pnand %p975_p0, %p235_p2  ;;  %s275_s14 = sshll.u32 %s1379_s13, 4  ;;  %s276_s14 = int_to_ptr.vmem [resolvable:$true] %s275_s14 }
  0x10   : > { %s264_s17 = sshll.u32 %s1380_s16, 4  ;;  %s1183_s18 = scalar_lea.vmem %s248_s10, 256  ;;  %s1480_s17 = int_to_ptr.vmem [resolvable:$true] %s264_s17 }
  0x11   : > { %s1764_s12 = scalar_select %p1467_p3, 1, 0 }
  0x12   : > { %p1081_p5 = pneg %p1467_p3  ;;  %p1184_p8 = scmp.ne.s32.totalorder %s248_s10, %s1183_s18 }
  0x13   : > { %p1191_p11 = scmp.lt.s32.totalorder %s248_s10, %s248_s10  ;;  %p1192_p12 = scmp.lt.s32.totalorder %s1183_s18, %s1183_s18 }
  0x14   : > { %p1476_p6 = pnand %p1081_p5, %p1757_p1 }
  0x15   : > { %p1193_p13 = por %p1192_p12, %p1191_p11 }
  0x16   : > { %p1174_p7 = pneg %p1476_p6 }
  0x18   : > { %p1186_p9 = pnand %p1184_p8, %p1174_p7 }
  0x1a   : > { %p1187_p10 = pneg %p1186_p9 }
  0x1c   : > { %p1194_p0 = pnand %p1193_p13, %p1187_p10 }
  0x1e   : > { %1197 = shalt.err (!%p1194_p0)
}
  0x1f   : > { %s1381_s19 = smov 64   ;;  %s1382_s20 = smov 4  }
  0x20   : > { %s1766_s1 = sld [smem:[#allocation16_spill]]  ;;  %s1209_s23 = scalar_lea.vmem %s276_s14, 128 }
  0x21   : > { %p1210_p2 = scmp.ne.s32.totalorder %s276_s14, %s1209_s23  ;;  %p1217_p9 = scmp.lt.s32.totalorder %s276_s14, %s276_s14 }
  0x22   : > { %p1218_p10 = scmp.lt.s32.totalorder %s1209_s23, %s1209_s23 }
  0x23   : > { %p1212_p5 = pnand %p1210_p2, %p1174_p7 }
  0x24   : > { %p1219_p11 = por %p1218_p10, %p1217_p9 }
  0x25   : > { %p1213_p8 = pneg %p1212_p5 }
  0x26   : > { %1084 = dma.hbm_to_vmem [thread:$0]  (!%p1476_p6), %s1766_s1, 256, %s248_s10, [#allocation6], %s1381_s19, %s1381_s19, %s1382_s20  }
  0x27   : > { %p1220_p12 = pnand %p1219_p11, %p1213_p8 }
  0x29   : > { %1223 = shalt.err (!%p1220_p12)
}
  0x2a   : > { %s1767_s4 = sld [smem:[#allocation18_spill]]  ;;  %s1235_s26 = scalar_lea.vmem %s1480_s17, 128 }
  0x2b   : > { %p1236_p13 = scmp.ne.s32.totalorder %s1480_s17, %s1235_s26  ;;  %p1243_p5 = scmp.lt.s32.totalorder %s1480_s17, %s1480_s17 }
  0x2c   : > { %p1244_p8 = scmp.lt.s32.totalorder %s1235_s26, %s1235_s26 }
  0x2d   : > { %p1238_p0 = pnand %p1236_p13, %p1174_p7 }
  0x2e   : > { %p1245_p9 = por %p1244_p8, %p1243_p5 }
  0x2f   : > { %p1239_p2 = pneg %p1238_p0 }
  0x30   : > { %1090 = dma.hbm_to_vmem [thread:$0]  (!%p1476_p6), %s1767_s4, 128, %s276_s14, [#allocation9]  }
  0x31   : > { %p1246_p10 = pnand %p1245_p9, %p1239_p2 }
  0x33   : > { %1249 = shalt.err (!%p1246_p10)
}
  0x34   : > { %s1768_s3 = sld [smem:[#allocation17_spill]]  ;;  %s1383_s13 = smov [#allocation10]  }
  0x35   : > { %s285_s14 = sshll.u32 %s1383_s13, 4  ;;  %s286_s14 = int_to_ptr.vmem [resolvable:$true] %s285_s14 }
  0x36   : > { %s1261_s16 = scalar_lea.vmem %s286_s14, 256  ;;  %p1269_p0 = scmp.lt.s32.totalorder %s286_s14, %s286_s14 }
  0x37   : > { %p1262_p11 = scmp.ne.s32.totalorder %s286_s14, %s1261_s16  ;;  %p1270_p2 = scmp.lt.s32.totalorder %s1261_s16, %s1261_s16 }
  0x39   : > { %p1264_p12 = pnand %p1262_p11, %p1174_p7  ;;  %p1271_p5 = por %p1270_p2, %p1269_p0 }
  0x3a   : > { %1087 = dma.hbm_to_vmem [thread:$0]  (!%p1476_p6), %s1768_s3, 128, %s1480_s17, [#allocation6]  }
  0x3b   : > { %p1265_p13 = pneg %p1264_p12 }
  0x3d   : > { %p1272_p8 = pnand %p1271_p5, %p1265_p13 }
  0x3f   : > { %1275 = shalt.err (!%p1272_p8)
}
  0x40   : > { %1093 = dma.hbm_to_vmem [thread:$0]  (!%p1476_p6), %s1754_s6, 256, %s286_s14, [#allocation9], %s1381_s19, %s1381_s19, %s1382_s20  }
  0x41   : > { %s974_s15 = sadd.s32 4294967294, %s1376_s30   ;;  %s1529_s21 = sadd.s32 1, %s1376_s30  }
  0x42   : > { %s30_s22 = ssub.s32 %s1376_s30, %s1529_s21  ;;  %s33_s23 = sadd.s32 1, %s1372_s29 }
  0x43   : > { %p31_p7 = scmp.eq.s32.totalorder %s30_s22, 0  ;;  %p40_p9 = scmp.ne.s32.totalorder %s1372_s29, %s1368_s28 }
  0x44   : > { %p41_p10 = scmp.eq.s32.totalorder %s1376_s30, 0  ;;  %p46_p11 = scmp.ne.s32.totalorder %s1368_s28, %s1364_s27 }
  0x45   : > { %s1540_s24 = scalar_select %p31_p7, %s1372_s29, %s33_s23  }
  0x46   : > { %p1542_p12 = por %p41_p10, %p40_p9  ;;  %p1548_p6 = por %p1757_p1, %p46_p11 }
  0x47   : > { %p222_p13 = scmp.eq.s32.totalorder %s1462_s11, 1  ;;  %p228_p0 = scmp.eq.s32.totalorder %s974_s15, 1 }
  0x48   : > { %s1770_s19 = scalar_select %p1548_p6, 1, 0 }
  0x49   : > { %p1106_p2 = scmp.lt.s32.totalorder %s1376_s30, 2  ;;  %s302_s20 = sand.u32 1, %s1372_s29  }
  0x4a   : > { %p1555_p5 = por %p222_p13, %p40_p9  ;;  %p1559_p8 = por %p228_p0, %p46_p11 }
  0x4b   : > { %s981_s10 = sshll.u32 %s302_s20, 3  ;;  %s982_s13 = sshll.u32 %s1376_s30, 7 }
  0x4c   : > { %s1771_s26 = scalar_select %p1555_p5, 1, 0 }
  0x4d   : > { %s1772_s9 = scalar_select %p1559_p8, 1, 0 }
  0x4e   : > { %s1567_s17 = scalar_lea.hbm %s1748_s0, %s982_s13  ;;  %s306_s18 = scalar_lea.vmem [#allocation2], %s981_s10 }
  0x4f   : > { %s313_s15 = sshll.u32 %s306_s18, 4  ;;  %p1571_p7 = pnand %p1106_p2, %p1542_p12  ;;  %s314_s15 = int_to_ptr.vmem [resolvable:$true] %s313_s15 }
  0x50   : > { %s303_s23 = scalar_lea.sflag [#allocation3], %s302_s20  ;;  %s1276_s1 = scalar_lea.hbm %s1567_s17, 128 }
  0x51   : > { %p1277_p9 = scmp.ne.s32.totalorder %s1567_s17, %s1276_s1  ;;  %p1278_p10 = pneg %p1571_p7 }
  0x52   : > { %s1281_s16 = scalar_lea.hbm %s1748_s0, 256  ;;  %p1282_p0 = scmp.lt.s32.totalorder %s1567_s17, %s1748_s0 }
  0x53   : > { %p1279_p11 = pnand %p1278_p10, %p1277_p9  ;;  %p1283_p12 = scmp.lt.s32.totalorder %s1281_s16, %s1276_s1 }
  0x55   : > { %p1280_p13 = pneg %p1279_p11  ;;  %p1284_p2 = por %p1283_p12, %p1282_p0 }
  0x57   : > { %p1285_p4 = pnand %p1284_p2, %p1280_p13 }
  0x59   : > { %1288 = shalt.err (!%p1285_p4)
}
  0x5a   : > { %s1289_s25 = scalar_lea.vmem %s314_s15, 128  ;;  %s1384_s20 = smov [#allocation2]  }
  0x5b   : > { %p1290_p1 = scmp.ne.s32.totalorder %s314_s15, %s1289_s25  ;;  %s1294_s3 = sshll.u32 %s1384_s20, 4  ;;  %s1295_s3 = int_to_ptr.vmem [resolvable:$false] %s1294_s3 }
  0x5c   : > { %s1296_s4 = scalar_lea.vmem %s1295_s3, 256  ;;  %p1297_p9 = scmp.lt.s32.totalorder %s314_s15, %s1295_s3 }
  0x5d   : > { %p1292_p8 = pnand %p1290_p1, %p1278_p10  ;;  %p1298_p11 = scmp.lt.s32.totalorder %s1296_s4, %s1289_s25 }
  0x5f   : > { %p1293_p5 = pneg %p1292_p8  ;;  %p1299_p6 = por %p1298_p11, %p1297_p9 }
  0x61   : > { %p1300_p3 = pnand %p1299_p6, %p1293_p5 }
  0x63   : > { %1303 = shalt.err (!%p1300_p3)
}
  0x64   : > { %1097 = dma.hbm_to_vmem [thread:$0]  (!%p1571_p7), %s1567_s17, 128, %s314_s15, %s303_s23  }
  0x65   : > { %p1774_p13 = scmp.ne.s32.totalorder %s1764_s12, 0 }
  0x66   : > { %s1592_s1 = sand.u32 (!%p1774_p13), 1, %s1368_s28   ;;  %p1775_p1 = scmp.ne.s32.totalorder (!%p1774_p13), %s1770_s19, 0 }
  0x67   : > { %328 = sbr.rel (%p1774_p13) target bundleno = 2056 (0x808), region = 52  ;;  %s984_s13 = sshll.u32 (!%p1774_p13), %s1592_s1, 3 }
  0x68   : > { %s331_s3 = scalar_lea.sflag (!%p1774_p13), [#allocation3], %s1592_s1  ;;  %s334_s4 = scalar_lea.vmem (!%p1774_p13), [#allocation2], %s984_s13 }
  0x6c   : > { %1347 = dma.done.wait (%p1775_p1), %s331_s3, 128  }
  0x6d   : > { %1349 = vsyncadd (%p1775_p1), %s331_s3, 4294967168  ;;  %p1776_p3 = scmp.eq.s32.totalorder %s1462_s11, 0 }
  0x6f   : > { %1351 = dma.done.wait (%p1776_p3), [#allocation6], 384   ;;  %p1777_p4 = pmov %p1776_p3 }
  0x70   : > { %p1778_p6 = pmov %p1776_p3 }
  0x71   : > { %1353 = vsyncadd (%p1777_p4), [#allocation6], 4294966912 }
  0x72   : > { %1355 = dma.done.wait (%p1778_p6), [#allocation9], 384   ;;  %p1779_p5 = pmov %p1776_p3 }
  0x73   : > { %v1385_v0 = vmov 0.0   ;;  %vm1386_vm0 = vmmov 0   ;;  %v1160_v1 = vld [vmem:[#allocation5 + $0x8] sm:$0xff]   ;;  %v1161_v2 = vld [vmem:[#allocation5] sm:$0xff]   ;;  %v390_v3 = vld [vmem:[%s334_s4] sm:$0xff]  ;;  %vm415_vm1 = vcmask 261120  }
  0x74   : > { %1357 = vsyncadd (%p1779_p5), [#allocation9], 4294966912  ;;  %1021 = vmatprep.subr.bf16.mxu0 %v1385_v0  ;;  %1025 = vmatprep.mubr.msk.bf16.mxu0 %vm1386_vm0, %v1385_v0  ;;  %v391_v4 = vpack.c.bf16 %v390_v3, %v390_v3  ;;  %v990_v5 = vld [vmem:[%s1750_s2] ss:$0 sm:$0xff]  ;;  %s1387_s17 = smov 96   ;;  %s1388_s15 = smov 112  }
  0x75   : > { %1029 = vmatprep.subr.bf16.mxu1 %v1385_v0  ;;  %1031 = vmatprep.mubr.msk.bf16.mxu1 %vm1386_vm0, %v1385_v0  ;;  %s1389_s22 = smov 16   ;;  %v464_v13 = vld [vmem:[#allocation8] sm:$0xff]  ;;  %s1390_s23 = smov 8   ;;  %vm467_vm2 = vcmask 1047680   ;;  %v463_v20 = vld [vmem:[#allocation7] sm:$0xff]  ;;  %vm548_vm3 = vcmask 130048  }
  0x76   : > { %1022 = vmatpush3.bf16.msra.mxu0 %v1160_v1  ;;  %s1391_s14 = smov 32   ;;  %s1392_s16 = smov 24   ;;  %vm644_vm4 = vcmask 64512   ;;  %vm677_vm5 = vcmask 1043456  }
  0x77   : > { %1023 = vmatprep.subr.bf16.mxu0 %v1385_v0  ;;  %s1393_s10 = smov 120   ;;  %p386_p8 = scmp.lt.s32.totalorder %s1462_s11, 1 }
  0x78   : > { %s1394_s4 = smov 64   ;;  %p1780_p10 = scmp.ne.s32.totalorder %s1771_s26, 0 }
  0x79   : > { %s387_s18 = scalar_select %p386_p8, %s1462_s11, 1 }
  0x7a   : > { %1024 = vmatpush3.bf16.msra.mxu0 %v1161_v2 }
  0x7b   : > { %1035 = vmatprep.subr.bf16.mxu0 %v1385_v0  ;;  %s388_s3 = scalar_lea.vmem %s1753_s5, %s387_s18 }
  0x7c   : > { %v994_v60 = vld [vmem:[%s388_s3] ss:$0 sm:$0xff] }
  0x7d   : > { %1026 = vmatmul.mubr.msk.bf16.vlgmr.msra.gmra.mxu0 %vm415_vm1, %v391_v4 }
  0x7e   : > { %1037 = vmatprep.mubr.msk.bf16.mxu0 %vm1386_vm0, %v1385_v0 }
 0x13d   : > { %v453_v6 = vpop.f32.mrf.mxu0 }
 0x13e   : > { %v1624_v7 = vadd.f32 %v990_v5, %v453_v6 }
 0x13f   : > { %v1027_v8 = vpop.f32.mrf.mxu0 }
 0x140   : > { %504 = vrot.lane.b32.xlu1 %v1624_v7, %s1387_s17  ;;  %460 = vrot.lane.b32.xlu0 %v1624_v7, %s1388_s15  ;;  %v465_v55 = vmul.f32 %v463_v20, %v1624_v7  ;;  %s385_s15 = scalar_lea.vmem [#allocation11], %s984_s13  ;;  %s1395_s13 = smov [#allocation11]  }
 0x141   : > { %v456_v9 = vpop.f32.mrf.mxu0  ;;  %s1308_s18 = sshll.u32 %s1395_s13, 4  ;;  %s1309_s18 = int_to_ptr.vmem [resolvable:$false] %s1308_s18 }
 0x142   : > { %s1310_s25 = scalar_lea.vmem %s1309_s18, 256 }
 0x143   : > { %v1028_v10 = vpop.f32.mrf.mxu0 }
 0x1b2   : > { %v1629_v11 = vpop.permute.xlu0 %460  ;;  %v505_v12 = vpop.permute.xlu1 %504 }
 0x1b3   : > { %506 = vrot.lane.b32.xlu0 %v1629_v11, %s1387_s17  ;;  %v466_v48 = vmul.f32 %v463_v20, %v1629_v11 }
 0x1b7   : > { %510 = vrot.lane.b32.xlu0 %v505_v12, %s1389_s22 }
 0x1bb   : > { %481 = vrot.lane.b32.xlu0 %v464_v13, %s1390_s23 }
 0x225   : > { %v507_v14 = vpop.permute.xlu0 %506 }
 0x226   : > { %513 = vrot.lane.b32.xlu1 %v507_v14, %s1389_s22 }
 0x229   : > { %v511_v15 = vpop.permute.xlu0 %510 }
 0x22a   : > { %v512_v16 = vsel %vm467_vm2, %v511_v15, %v505_v12 }
 0x22b   : > { %516 = vrot.lane.b32.xlu0 %v512_v16, %s1389_s22 }
 0x22d   : > { %v482_v19 = vpop.permute.xlu0 %481 }
 0x298   : > { %v514_v17 = vpop.permute.xlu1 %513 }
 0x299   : > { %v515_v18 = vsel %vm467_vm2, %v514_v17, %v507_v14 }
 0x29a   : > { %518 = vrot.lane.b32.xlu1 %v515_v18, %s1389_s22 }
 0x29d   : > { %v517_v21 = vpop.permute.xlu0 %516 }
 0x29e   : > { %471 = vrot.lane.b32.xlu1 %v1629_v11, %s1389_s22  ;;  %v520_v22 = vsel %vm467_vm2, %v517_v21, %v505_v12  ;;  %v670_v12 = vpack.c.bf16 %v1629_v11, %v1629_v11 }
 0x29f   : > { %v522_v23 = vmul.f32 %v520_v22, %v482_v19 }
 0x2a2   : > { %499 = vrot.lane.b32.xlu1 %v463_v20, %s1391_s14 }
 0x2a6   : > { %468 = vrot.lane.b32.xlu1 %v1624_v7, %s1389_s22 }
 0x2aa   : > { %526 = vrot.lane.b32.xlu1 %v522_v23, %s1392_s16 }
 0x30c   : > { %v519_v24 = vpop.permute.xlu1 %518 }
 0x30d   : > { %v521_v25 = vsel %vm467_vm2, %v519_v24, %v507_v14  ;;  %v669_v24 = vpack.c.bf16 %v1624_v7, %v1624_v7 }
 0x30e   : > { %v523_v26 = vmul.f32 %v521_v25, %v482_v19 }
 0x310   : > { %528 = vrot.lane.b32.xlu0 %v523_v26, %s1392_s16  ;;  %v472_v27 = vpop.permute.xlu1 %471 }
 0x311   : > { %v473_v28 = vsel %vm467_vm2, %v472_v27, %v1629_v11 }
 0x314   : > { %476 = vrot.lane.b32.xlu0 %v473_v28, %s1389_s22  ;;  %v500_v29 = vpop.permute.xlu1 %499 }
 0x315   : > { %v503_v32 = vmul.f32 %v500_v29, %v1629_v11  ;;  %v502_v35 = vmul.f32 %v500_v29, %v1624_v7 }
 0x318   : > { %v469_v30 = vpop.permute.xlu1 %468 }
 0x319   : > { %v470_v31 = vsel %vm467_vm2, %v469_v30, %v1624_v7 }
 0x31a   : > { %474 = vrot.lane.b32.xlu0 %v470_v31, %s1389_s22 }
 0x31c   : > { %v527_v33 = vpop.permute.xlu1 %526 }
 0x31d   : > { %v532_v37 = vadd.f32 %v527_v33, %v502_v35  ;;  %v1163_v35 = vld [vmem:[#allocation10] sm:$0xff]  }
 0x31f   : > { %v536_v42 = vpack.c.bf16 %v532_v37, %v532_v37 }
 0x382   : > { %v529_v34 = vpop.permute.xlu0 %528 }
 0x383   : > { %v533_v36 = vadd.f32 %v529_v34, %v503_v32 }
 0x385   : > { %v537_v38 = vpack.c.bf16 %v533_v36, %v533_v36 }
 0x386   : > { %v477_v39 = vpop.permute.xlu0 %476 }
 0x387   : > { %v479_v40 = vsel %vm467_vm2, %v477_v39, %v1629_v11  ;;  %596 = vrot.lane.b32.xlu1 %v537_v38, %s1387_s17 }
 0x388   : > { %v485_v41 = vmul.f32 %v482_v19, %v479_v40 }
 0x38a   : > { %490 = vrot.lane.b32.xlu0 %v485_v41, %s1393_s10 }
 0x38b   : > { %546 = vrot.lane.b32.xlu1 %v536_v42, %s1387_s17  ;;  %s1004_s17 = sshll.u32 %s1462_s11, 7  ;;  %s844_s11 = scalar_lea.sflag [#allocation4], %s1592_s1 }
 0x38c   : > { %v475_v43 = vpop.permute.xlu0 %474  ;;  %s1704_s16 = scalar_lea.hbm %s1756_s8, %s1004_s17 }
 0x38d   : > { %v478_v44 = vsel %vm467_vm2, %v475_v43, %v1624_v7  ;;  %v1162_v7 = vld [vmem:[#allocation10 + $0x8] sm:$0xff]  }
 0x38e   : > { %v484_v45 = vmul.f32 %v482_v19, %v478_v44 }
 0x390   : > { %488 = vrot.lane.b32.xlu0 %v484_v45, %s1393_s10 }
 0x3f9   : > { %v597_v46 = vpop.permute.xlu1 %596 }
 0x3fa   : > { %v602_v47 = vsel %vm548_vm3, %v597_v46, 0 }
 0x3fb   : > { %1036 = vmatpush3.bf16.xpose.msra.mxu0 %v602_v47 }
 0x3fc   : > { %v491_v49 = vpop.permute.xlu0 %490  ;;  %1047 = vmatprep.subr.bf16.mxu0 %v1385_v0 }
 0x3fd   : > { %v495_v50 = vadd.f32 %v491_v49, %v466_v48  ;;  %v547_v51 = vpop.permute.xlu1 %546 }
 0x3fe   : > { %v553_v52 = vsel %vm548_vm3, %v547_v51, 0 }
 0x3ff   : > { %v497_v53 = vmul.f32 0.25, %v495_v50  ;;  %1030 = vmatpush3.bf16.xpose.msra.mxu1 %v553_v52 }
 0x400   : > { %1041 = vmatprep.subr.bf16.mxu1 %v1385_v0 }
 0x401   : > { %v535_v54 = vpack.c.bf16 %v497_v53, %v497_v53 }
 0x402   : > { %v489_v56 = vpop.permute.xlu0 %488 }
 0x403   : > { %v494_v57 = vadd.f32 %v489_v56, %v465_v55  ;;  %1038 = vmatmul.mubr.msk.bf16.vlgmr.msra.gmra.mxu0 %vm548_vm3, %v535_v54 }
 0x404   : > { %1049 = vmatprep.mubr.msk.bf16.mxu0 %vm1386_vm0, %v1385_v0 }
 0x405   : > { %v496_v58 = vmul.f32 0.25, %v494_v57 }
 0x407   : > { %v534_v59 = vpack.c.bf16 %v496_v58, %v496_v58 }
 0x409   : > { %1032 = vmatmul.mubr.msk.bf16.vlgmr.msra.gmra.mxu1 %vm548_vm3, %v534_v59 }
 0x40a   : > { %1043 = vmatprep.mubr.msk.bf16.mxu1 %vm1386_vm0, %v1385_v0 }
 0x4c3   : > { %v638_v61 = vpop.f32.mrf.mxu0 }
 0x4c4   : > { %v639_v62 = vadd.f32 %v994_v60, %v638_v61 }
 0x4c5   : > { %v1039_v63 = vpop.f32.mrf.mxu0 }
 0x4c6   : > { %v648_v1 = vsel %vm644_vm4, %v639_v62, -inf }
 0x4c7   : > { %649 = vmax.xlane.f32.xlu1 %v648_v1  ;;  %v641_v2 = vpop.f32.mrf.mxu0 }
 0x4c9   : > { %v589_v3 = vpop.f32.mrf.mxu1  ;;  %v1040_v4 = vpop.f32.mrf.mxu0 }
 0x4ca   : > { %v590_v5 = vadd.f32 %v994_v60, %v589_v3 }
 0x4cb   : > { %v1033_v6 = vpop.f32.mrf.mxu1 }
 0x4cc   : > { %v645_v8 = vsel %vm644_vm4, %v590_v5, -inf }
 0x4cd   : > { %646 = vmax.xlane.f32.xlu0 %v645_v8  ;;  %v592_v9 = vpop.f32.mrf.mxu1 }
 0x4cf   : > { %v1034_v10 = vpop.f32.mrf.mxu1 }
 0x4d8   : > { %722 = vrot.lane.b32.xlu1 %v670_v12, %s1394_s4 }
 0x550   : > { %v650_v13 = vpop.xlane.xlu1 %649 }
 0x551   : > { %v652_v14 = vsub.f32 %v639_v62, %v650_v13 }
 0x553   : > { %v655_v15 = vmul.f32 1.442695, %v652_v14 }
 0x554   : > { %v723_v16 = vpop.permute.xlu1 %722 }
 0x555   : > { %1164 = vpow2.f32 %v655_v15  ;;  %v728_v17 = vsel %vm677_vm5, %v723_v16, 0 }
 0x556   : > { %v647_v18 = vpop.xlane.xlu0 %646  ;;  %1048 = vmatpush3.bf16.msra.mxu0 %v728_v17 }
 0x557   : > { %v651_v19 = vsub.f32 %v590_v5, %v647_v18 }
 0x559   : > { %v653_v20 = vmul.f32 1.442695, %v651_v19 }
 0x55b   : > { %1166 = vpow2.f32 %v653_v20 }
 0x562   : > { %v1165_v21 = vpop.eup %1164 }
 0x563   : > { %v660_v22 = vsel %vm644_vm4, %v1165_v21, 0.0 }
 0x564   : > { %661 = vadd.xlane.f32.xlu0 %v660_v22 }
 0x568   : > { %v1167_v11 = vpop.eup %1166 }
 0x569   : > { %v657_v23 = vsel %vm644_vm4, %v1167_v11, 0.0 }
 0x56a   : > { %658 = vadd.xlane.f32.xlu0 %v657_v23 }
 0x580   : > { %672 = vrot.lane.b32.xlu0 %v669_v24, %s1394_s4 }
 0x5ed   : > { %v662_v25 = vpop.xlane.xlu0 %661 }
 0x5ee   : > { %1168 = vrcp.f32 %v662_v25 }
 0x5f3   : > { %v659_v26 = vpop.xlane.xlu0 %658 }
 0x5f4   : > { %1170 = vrcp.f32 %v659_v26 }
 0x5f7   : > { %v673_v27 = vpop.permute.xlu0 %672 }
 0x5f8   : > { %v679_v28 = vsel %vm677_vm5, %v673_v27, 0 }
 0x5f9   : > { %1042 = vmatpush3.bf16.msra.mxu1 %v679_v28 }
 0x5fa   : > { %1053 = vmatprep.subr.bf16.mxu1 %v1385_v0 }
 0x5fb   : > { %v1169_v29 = vpop.eup %1168 }
 0x5fc   : > { %v666_v30 = vmul.f32 %v1169_v29, %v1165_v21 }
 0x5fe   : > { %v668_v31 = vpack.c.bf16 %v666_v30, %v666_v30 }
 0x600   : > { %1050 = vmatmul.mubr.msk.bf16.vlgmr.msra.gmra.mxu0 %vm644_vm4, %v668_v31 }
 0x601   : > { %v1171_v32 = vpop.eup %1170 }
 0x602   : > { %v665_v33 = vmul.f32 %v1171_v32, %v1167_v11 }
 0x604   : > { %v667_v34 = vpack.c.bf16 %v665_v33, %v665_v33 }
 0x606   : > { %1044 = vmatmul.mubr.msk.bf16.vlgmr.msra.gmra.mxu1 %vm644_vm4, %v667_v34 }
 0x607   : > { %1057 = vmatprep.mubr.msk.bf16.mxu1 %vm1386_vm0, %v1385_v0  ;;  %1054 = vmatpush3.bf16.msra.mxu1 %v1162_v7 }
 0x608   : > { %1055 = vmatprep.subr.bf16.mxu1 %v1385_v0  ;;  %v999_v0 = vld [vmem:[%s1755_s7] ss:$0 sm:$0xff] }
 0x60b   : > { %1056 = vmatpush3.bf16.msra.mxu1 %v1163_v35 }
 0x6c0   : > { %v764_v36 = vpop.f32.mrf.mxu0 }
 0x6c1   : > { %771 = vrot.lane.b32.xlu1 %v764_v36, %s1389_s22  ;;  %s857_s22 = sshll.u32 %s385_s15, 4  ;;  %s1706_s22 = int_to_ptr.vmem [resolvable:$true] %s857_s22 }
 0x6c2   : > { %v1051_v37 = vpop.f32.mrf.mxu0  ;;  %s1304_s10 = scalar_lea.vmem %s1706_s22, 128  ;;  %p1311_p2 = scmp.lt.s32.totalorder %s1706_s22, %s1309_s18 }
 0x6c3   : > { %p1305_p7 = scmp.ne.s32.totalorder %s1706_s22, %s1304_s10  ;;  %p1312_p9 = scmp.lt.s32.totalorder %s1310_s25, %s1304_s10 }
 0x6c4   : > { %v767_v38 = vpop.f32.mrf.mxu0 }
 0x6c5   : > { %p1306_p0 = pnand %p1305_p7, %p1780_p10  ;;  %p1313_p11 = por %p1312_p9, %p1311_p2 }
 0x6c6   : > { %v715_v39 = vpop.f32.mrf.mxu1  ;;  %v1052_v40 = vpop.f32.mrf.mxu0 }
 0x6c7   : > { %p1307_p12 = pneg %p1306_p0 }
 0x6c8   : > { %v1045_v41 = vpop.f32.mrf.mxu1 }
 0x6c9   : > { %p1314_p13 = pnand %p1313_p11, %p1307_p12 }
 0x6ca   : > { %v718_v42 = vpop.f32.mrf.mxu1 }
 0x6cc   : > { %v1046_v43 = vpop.f32.mrf.mxu1 }
 0x733   : > { %v772_v44 = vpop.permute.xlu1 %771 }
 0x734   : > { %v774_v45 = vsel %vm548_vm3, %v715_v39, %v772_v44 }
 0x735   : > { %v775_v46 = vpack.c.bf16 %v774_v45, %v774_v45 }
 0x737   : > { %1058 = vmatmul.mubr.msk.bf16.vlgmr.msra.gmra.mxu1 %vm415_vm1, %v775_v46 }
 0x7f7   : > { %v836_v47 = vpop.f32.mrf.mxu1 }
 0x7f8   : > { %v837_v48 = vadd.f32 %v999_v0, %v836_v47 }
 0x7f9   : > { %v1059_v49 = vpop.f32.mrf.mxu1 }
 0x7fa   : > { %842 = vst.msk [vmem:[%s385_s15] sm:$0xff] %vm415_vm1, %v837_v48 }
 0x7fb   : > { %v839_v50 = vpop.f32.mrf.mxu1 }
 0x7fc   : > { %1317 = shalt.err (!%p1314_p13)
}
 0x7fd   : > { %s1318_s20 = scalar_lea.hbm %s1704_s16, 128  ;;  %s1322_s4 = scalar_lea.hbm %s1756_s8, 256 }
 0x7fe   : > { %p1319_p1 = scmp.ne.s32.totalorder %s1704_s16, %s1318_s20  ;;  %p1323_p6 = scmp.lt.s32.totalorder %s1704_s16, %s1756_s8 }
 0x7ff   : > { %p1324_p5 = scmp.lt.s32.totalorder %s1322_s4, %s1318_s20 }
 0x800   : > { %p1320_p3 = pnand %p1319_p1, %p1780_p10 }
 0x801   : > { %p1325_p8 = por %p1324_p5, %p1323_p6 }
 0x802   : > { %p1321_p4 = pneg %p1320_p3 }
 0x804   : > { %p1326_p7 = pnand %p1325_p8, %p1321_p4 }
 0x806   : > { %1329 = shalt.err (!%p1326_p7)
}
 0x807   : > { %1079 = dma.vmem_to_hbm [thread:$0]  (%p1780_p10), %s1706_s22, 128, %s1704_s16, %s844_s11   ;;  %v1060_v51 = vpop.f32.mrf.mxu1 }
 0x808 PF: > { %s869_s17 = sand.u32 1, %s1364_s27   ;;  %p1781_p0 = scmp.ne.s32.totalorder %s1772_s9, 0 }
 0x809   : > { %p1782_p12 = scmp.ge.s32.totalorder %s1376_s30, 2  ;;  %s870_s15 = scalar_lea.sflag [#allocation4], %s869_s17 }
 0x80b   : > { %p1099_p2 = pnand %p1782_p12, %p1781_p0 }
 0x80d   : > { %p1100_p9 = pneg %p1099_p2 }
 0x80f   : > { %1359 = dma.done.wait (%p1100_p9), %s870_s15, 128  }
 0x810   : > { %1361 = vsyncadd (%p1100_p9), %s870_s15, 4294967168  ;;  %p23_p11 = scmp.ge.s32.totalorder %s1529_s21, 4   ;;  %s1783_s27 = smov %s1368_s28 }
 0x811   : > { %s1784_s28 = smov %s1372_s29  ;;  %s1785_s29 = smov %s1540_s24 }
 0x812   : > { %s1786_s30 = smov %s1529_s21  ;;  %25 = sbr.rel (!%p23_p11) target bundleno = 11 (0xb), region = 116 }
 0x817   :  { %875 = vsyncpa [#allocation3], 1 }
 0x818   :  { %877 = vsyncpa [#allocation3 + $0x1], 1 }
 0x819   :  { %878 = vsyncpa [#allocation6], 1 }
 0x81a   :  { %879 = vsyncpa [#allocation9], 1 }
 0x81b   :  { %880 = vsyncpa [#allocation4], 1 }
 0x81c   :  { %882 = vsyncpa [#allocation4 + $0x1], 1 }

</bundles_post_ra>
